<compile_context>
chip_gen: v5e
topology: v5e:2x2
jax: 0.10.0
libtpu: 0.0.40
codegen_flags: <defaults>
</compile_context>

<pallas_src>
import functools

import jax
import jax.numpy as jnp
from jax import lax
from jax.experimental import pallas as pl
from jax.experimental.pallas import tpu as pltpu


# ---------------------------------------------------------------------------
# Tuning constants / small helpers
# ---------------------------------------------------------------------------
_TARGET_BLOCK_BYTES = 4 << 20      # ~4 MiB per buffered stream (review: 2-8 MiB)
_TWO_PHASE_TILE_BYTES = 2 << 20    # ~2 MiB per (1, C, T) block in the fallback
_POOL_CHUNK = 512                  # lanes converted to f32 at a time in the pool
_PAD_HW_MAX = 4096                 # pad-to-128 only for small feature maps
_MIN_GRID_STEPS = 8                # aim for >= min(8, N) fused grid steps


def _cdiv(a, b):
    return -(-a // b)


def _vmem_limit_bytes():
    """Scoped-VMEM limit to request: ~3/4 of physical per-core VMEM."""
    phys = 0
    try:
        phys = int(pltpu.get_tpu_info().vmem_capacity_bytes)
    except Exception:
        phys = 0
    if phys <= 0:
        # Derive per-generation capacity from the device kind instead of
        # silently assuming 64 MiB (which would halve the budget on v5e/v6e).
        kind = ""
        try:
            kind = jax.devices()[0].device_kind.lower()
        except Exception:
            kind = ""
        phys = 64 * 1024 * 1024 if "v7" in kind else 128 * 1024 * 1024
    return (phys * 3) // 4


def _pick_nb(n, per_n_bytes, target_bytes=_TARGET_BLOCK_BYTES,
             min_steps=_MIN_GRID_STEPS):
    """Batch size along N per fused grid step.

    Target a few-MiB block (the kernel is HBM-DMA bound; bigger blocks buy
    nothing), keep >= min(min_steps, n) grid steps for pipelining, and prefer
    an even step count (v7x has 2 TensorCores sharing HBM).
    """
    nb = max(1, target_bytes // max(1, per_n_bytes))
    nb = min(nb, n)
    if n > 1:
        nb = min(nb, max(1, n // min(min_steps, n)))
        while nb > 1 and _cdiv(n, nb) % 2 == 1:
            nb -= 1
    return int(nb)


# ---------------------------------------------------------------------------
# In-kernel pooled sum with an explicit f32 accumulator (no f32 slab copy)
# ---------------------------------------------------------------------------
def _pool_sum_f32(x_ref, chunk=_POOL_CHUNK):
    """Sum x_ref over the lane (last) axis into an f32 accumulator.

    Reads `chunk`-lane slabs straight from the ref, so at most one
    (Nb, C, chunk) f32 temporary ever exists -- for bf16 inputs the whole
    resident block is never converted/materialized in f32.
    """
    nb, c, hwp = x_ref.shape
    nfull = hwp // chunk
    rem = hwp - nfull * chunk
    acc = jnp.zeros((nb, c), jnp.float32)

    if nfull > 0:
        def body(k, a):
            off = pl.multiple_of(k * chunk, 128)
            xs = x_ref[:, :, pl.ds(off, chunk)]
            return a + jnp.sum(xs.astype(jnp.float32), axis=-1)
        acc = lax.fori_loop(0, nfull, body, acc)
    if rem:
        xs = x_ref[:, :, pl.ds(nfull * chunk, rem)]
        acc = acc + jnp.sum(xs.astype(jnp.float32), axis=-1)
    return acc                                                   # (Nb, C) f32


# ---------------------------------------------------------------------------
# Fused single-pass kernel: pool + SE + rescale on a resident (Nb, C, HWp) slab
# ---------------------------------------------------------------------------
def _ca_fused_kernel(x_ref, w1_ref, w2_ref, o_ref, *, inv_hw):
    # x_ref / o_ref block: (Nb, C, HWp); w1: (Cr, C); w2: (C, Cr)
    acc = _pool_sum_f32(x_ref)                                   # (Nb, C) f32
    m = acc * inv_hw                                             # mean over true HW

    # Squeeze-excite: two 1x1 convs == two small matmuls, batched over Nb.
    h = lax.dot_general(m, w1_ref[...],
                        dimension_numbers=(((1,), (1,)), ((), ())),
                        preferred_element_type=jnp.float32)      # (Nb, Cr)
    h = jnp.maximum(h, 0.0)
    y = lax.dot_general(h, w2_ref[...],
                        dimension_numbers=(((1,), (1,)), ((), ())),
                        preferred_element_type=jnp.float32)      # (Nb, C)
    y = jax.nn.sigmoid(y)

    # Channel-wise rescale in the input dtype, broadcast over spatial lanes.
    x = x_ref[...]
    o_ref[...] = x * y[:, :, None].astype(x.dtype)


def _ca_fused(x3, w1, w2, *, nb, hw_true, vmem_limit, donate):
    n, c, hwp = x3.shape
    itemsize = jnp.dtype(x3.dtype).itemsize
    kernel = functools.partial(_ca_fused_kernel, inv_hw=1.0 / float(hw_true))
    cost = pl.CostEstimate(
        flops=int(3 * n * c * hwp + 4 * n * c * w1.shape[0]),
        transcendentals=int(n * c),
        bytes_accessed=int(2 * n * c * hwp * itemsize
                           + (w1.size + w2.size) * jnp.dtype(w1.dtype).itemsize),
    )
    aliases = {0: 0} if donate else {}

    def build(single_buffer_out):
        out_kwargs = dict(pipeline_mode=pl.Buffered(1)) if single_buffer_out else {}
        return pl.pallas_call(
            kernel,
            out_shape=jax.ShapeDtypeStruct((n, c, hwp), x3.dtype),
            grid=(_cdiv(n, nb),),
            in_specs=[
                pl.BlockSpec((nb, c, hwp), lambda i: (i, 0, 0)),
                pl.BlockSpec(w1.shape, lambda i: (0, 0)),
                pl.BlockSpec(w2.shape, lambda i: (0, 0)),
            ],
            out_specs=pl.BlockSpec((nb, c, hwp), lambda i: (i, 0, 0),
                                   **out_kwargs),
            input_output_aliases=aliases,
            compiler_params=pltpu.CompilerParams(
                dimension_semantics=("parallel",),
                vmem_limit_bytes=int(vmem_limit),
            ),
            cost_estimate=cost,
        )

    try:
        # Single-buffer the output stream: compute << DMA here, and the 3x
        # (instead of 4x) block footprint keeps the 2x-traffic fused path
        # viable inside v7x's 64 MiB VMEM.
        return build(True)(x3, w1, w2)
    except Exception:
        # pipeline_mode unsupported on this jax version -> default buffering.
        return build(False)(x3, w1, w2)


# ---------------------------------------------------------------------------
# Two-phase fallback for large C*HW: (1) tiled pool + SE, (2) tiled rescale
# ---------------------------------------------------------------------------
def _pool_se_kernel(x_ref, w1_ref, w2_ref, y_ref, acc_ref, *,
                    hw_eff, hw_true, masked):
    # Grid = (N, HW tiles); spatial reduction axis is last ("arbitrary").
    j = pl.program_id(1)

    @pl.when(j == 0)
    def _init():
        acc_ref[...] = jnp.zeros_like(acc_ref)

    t = x_ref.shape[-1]
    xv = x_ref[...].astype(jnp.float32)                          # (1, C, T)
    if masked:
        # Only emitted when T does not divide HWp: mask the Pallas-clipped
        # (undefined) lanes of the partial last spatial tile.
        col = j * t + lax.broadcasted_iota(jnp.int32, (1, 1, t), 2)
        xv = jnp.where(col < hw_eff, xv, 0.0)
    acc_ref[...] += jnp.sum(xv, axis=-1)                         # (1, C)

    @pl.when(j == pl.num_programs(1) - 1)
    def _finish():
        m = acc_ref[...] * (1.0 / float(hw_true))                # (1, C)
        h = lax.dot_general(m, w1_ref[...],
                            dimension_numbers=(((1,), (1,)), ((), ())),
                            preferred_element_type=jnp.float32)  # (1, Cr)
        h = jnp.maximum(h, 0.0)
        yv = lax.dot_general(h, w2_ref[...],
                             dimension_numbers=(((1,), (1,)), ((), ())),
                             preferred_element_type=jnp.float32) # (1, C)
        y_ref[...] = jax.nn.sigmoid(yv)[:, :, None]              # (1, C, 1)


def _scale_kernel(x_ref, y_ref, o_ref):
    # x_ref / o_ref: (1, C, T); y_ref: (1, C, 1) f32 channel scales
    x = x_ref[...]
    o_ref[...] = x * y_ref[...].astype(x.dtype)


def _ca_two_phase(x3, w1, w2, *, hw_true, vmem_limit, donate):
    n, c, hwp = x3.shape
    itemsize = jnp.dtype(x3.dtype).itemsize

    # Spatial tile: ~2 MiB per (1, C, T) block (512-lane-class tiles already
    # reach ~85% of the HBM roofline), multiple of 128 lanes, and >= 4 tiles
    # when the spatial extent allows it (pipelining + both v7x TensorCores).
    t = (_TWO_PHASE_TILE_BYTES // (c * itemsize)) // 128 * 128
    t = max(128, min(t, hwp))
    if hwp >= 4 * 128:
        t = min(t, max(128, (hwp // 4) // 128 * 128))
    n_hw = _cdiv(hwp, t)

    pool_kernel = functools.partial(_pool_se_kernel, hw_eff=hwp,
                                    hw_true=hw_true, masked=(hwp % t != 0))
    pool_cost = pl.CostEstimate(
        flops=int(n * c * hwp + 4 * n * c * w1.shape[0]),
        transcendentals=int(n * c),
        bytes_accessed=int(n * c * hwp * itemsize),
    )
    # Phase 1: pooled + squeeze-excite channel scales y: (N, C, 1) f32.
    y = pl.pallas_call(
        pool_kernel,
        out_shape=jax.ShapeDtypeStruct((n, c, 1), jnp.float32),
        grid=(n, n_hw),
        in_specs=[
            pl.BlockSpec((1, c, t), lambda i, j: (i, 0, j)),
            pl.BlockSpec(w1.shape, lambda i, j: (0, 0)),
            pl.BlockSpec(w2.shape, lambda i, j: (0, 0)),
        ],
        out_specs=pl.BlockSpec((1, c, 1), lambda i, j: (i, 0, 0)),
        scratch_shapes=[pltpu.VMEM((1, c), jnp.float32)],
        compiler_params=pltpu.CompilerParams(
            dimension_semantics=("parallel", "arbitrary"),
            vmem_limit_bytes=int(vmem_limit),
        ),
        cost_estimate=pool_cost,
    )(x3, w1, w2)

    scale_cost = pl.CostEstimate(
        flops=int(n * c * hwp), transcendentals=0,
        bytes_accessed=int(2 * n * c * hwp * itemsize),
    )
    # Phase 2: spatially tiled rescale (pure HBM streaming, both axes parallel).
    out3 = pl.pallas_call(
        _scale_kernel,
        out_shape=jax.ShapeDtypeStruct((n, c, hwp), x3.dtype),
        grid=(n, n_hw),
        in_specs=[
            pl.BlockSpec((1, c, t), lambda i, j: (i, 0, j)),
            pl.BlockSpec((1, c, 1), lambda i, j: (i, 0, 0)),
        ],
        out_specs=pl.BlockSpec((1, c, t), lambda i, j: (i, 0, j)),
        input_output_aliases=({0: 0} if donate else {}),
        compiler_params=pltpu.CompilerParams(
            dimension_semantics=("parallel", "parallel"),
            vmem_limit_bytes=int(vmem_limit),
        ),
        cost_estimate=scale_cost,
    )(x3, y)
    return out3


# ---------------------------------------------------------------------------
# Public wrapper
# ---------------------------------------------------------------------------
def ca_layer(x, w1, w2, *, donate_x=False, force_two_phase=False):
    """Channel attention: x * sigmoid(W2 @ relu(W1 @ avgpool(x))).

    x: (N, C, H, W); w1: (C//r, C); w2: (C, C//r).  Matches the PyTorch
    CALayer forward with bias=False (the module's default).

    donate_x: only set True when the caller actually donates x's buffer
    (jax.jit donate_argnums / buffer donation); otherwise XLA inserts a
    defensive copy that costs more than the aliasing saves.
    """
    n, c, h, w = x.shape
    hw = h * w
    itemsize = jnp.dtype(x.dtype).itemsize
    vmem_limit = _vmem_limit_bytes()

    # Lane-dense padding for small, non-128-multiple spatial sizes (7x7,
    # 14x14, ...): padded lanes are zeros, so the pooled sum is unchanged and
    # the true HW is used as the divisor.  Large maps are left as-is (the pad
    # would cost a full extra HBM pass).
    hw_eff = hw
    if hw % 128 != 0 and hw <= _PAD_HW_MAX:
        hw_eff = _cdiv(hw, 128) * 128

    x3 = x.reshape(n, c, hw)
    if hw_eff != hw:
        x3 = jnp.pad(x3, ((0, 0), (0, 0), (0, hw_eff - hw)))

    per_n_bytes = c * hw_eff * itemsize
    fused_budget = (vmem_limit * 7) // 10        # headroom for weights/compiler
    # Fused path footprint: 2 input buffers + 1 (single-buffered) output.
    fits_fused = 3 * per_n_bytes <= fused_budget
    # N == 1 with a huge slab would be a single unpipelined step on one core;
    # the spatially tiled two-phase path pipelines and feeds both v7x cores.
    single_huge_step = (n == 1 and per_n_bytes > 2 * _TARGET_BLOCK_BYTES)

    if not force_two_phase and fits_fused and not single_huge_step:
        nb = _pick_nb(n, per_n_bytes)
        out3 = _ca_fused(x3, w1, w2, nb=nb, hw_true=hw,
                         vmem_limit=vmem_limit, donate=donate_x)
    else:
        out3 = _ca_two_phase(x3, w1, w2, hw_true=hw,
                             vmem_limit=vmem_limit, donate=donate_x)

    if hw_eff != hw:
        out3 = out3[:, :, :hw]
    return out3.reshape(n, c, h, w)


def ca_layer_ref(x, w1, w2):
    # pure-JAX reference for correctness checking
    m = jnp.mean(x, axis=(2, 3))                                   # (N, C)
    h = jnp.maximum(jnp.einsum("rc,nc->nr", w1, m), 0.0)           # (N, Cr)
    y = jax.nn.sigmoid(jnp.einsum("cr,nr->nc", w2, h))             # (N, C)
    return x * y[:, :, None, None]


if __name__ == "__main__":
    # Small shapes consistent with the module: reduction=16 requires C >= 16.
    N, C, H, W = 2, 32, 16, 16
    reduction = 16
    Cr = C // reduction

    key = jax.random.PRNGKey(0)
    kx, k1, k2 = jax.random.split(key, 3)

    x = jax.random.normal(kx, (N, C, H, W), dtype=jnp.float32)
    # Conv2d 1x1 (bias=False) weights: (Cr, C) and (C, Cr).
    w1 = jax.random.normal(k1, (Cr, C), dtype=jnp.float32) * (1.0 / jnp.sqrt(C))
    w2 = jax.random.normal(k2, (C, Cr), dtype=jnp.float32) * (1.0 / jnp.sqrt(Cr))

    ref = ca_layer_ref(x, w1, w2)

    # Fused single-pass path (few-MiB blocks, even grid, single-buffered out).
    out = jax.block_until_ready(ca_layer(x, w1, w2))
    assert out.shape == (N, C, H, W)
    assert jnp.allclose(out, ref, atol=1e-5, rtol=1e-5), "fused path mismatch"

    # Two-phase fallback (used when one (1, C, H*W) slab does not fit VMEM).
    out2 = jax.block_until_ready(ca_layer(x, w1, w2, force_two_phase=True))
    assert jnp.allclose(out2, ref, atol=1e-5, rtol=1e-5), "two-phase path mismatch"

    # Small unaligned spatial size exercises the lane-dense padding path.
    xs = jax.random.normal(kx, (N, C, 7, 7), dtype=jnp.float32)
    refs = ca_layer_ref(xs, w1, w2)
    outs = jax.block_until_ready(ca_layer(xs, w1, w2))
    assert outs.shape == (N, C, 7, 7)
    assert jnp.allclose(outs, refs, atol=1e-5, rtol=1e-5), "padded path mismatch"

    print("KERNEL_OK")
</pallas_src>

<mosaic_0001>
module attributes {stable_mosaic.version = 11 : i64} {
  func.func @_ca_fused_kernel(%arg0: i32, %arg1: memref<1x32x256xf32, #tpu.memory_space<vmem>>, %arg2: memref<2x32xf32, #tpu.memory_space<vmem>>, %arg3: memref<32x2xf32, #tpu.memory_space<vmem>>, %arg4: memref<1x32x256xf32, #tpu.memory_space<vmem>>) attributes {dimension_semantics = [#tpu.dimension_semantics<parallel>], iteration_bounds = array<i64: 2>, scalar_prefetch = 0 : i64, scratch_operands = 0 : i64, tpu.core_type = #tpu.core_type<tc>, window_params = [{transform_indices = @transform_0, window_bounds = array<i64: 1, 32, 256>}, {pipeline_mode = #tpu.pipeline_mode<synchronous>, transform_indices = @transform_1, window_bounds = array<i64: 2, 32>}, {pipeline_mode = #tpu.pipeline_mode<synchronous>, transform_indices = @transform_2, window_bounds = array<i64: 32, 2>}, {pipeline_mode = #tpu.pipeline_mode<synchronous>, transform_indices = @transform_3, window_bounds = array<i64: 1, 32, 256>}]} {
    %cst = arith.constant 0.000000e+00 : f32
    %0 = vector.broadcast %cst : f32 to vector<1x32xf32>
    %c0 = arith.constant 0 : index
    %c0_0 = arith.constant 0 : index
    %c0_1 = arith.constant 0 : index
    %1 = vector.load %arg1[%c0, %c0_0, %c0_1] : memref<1x32x256xf32, #tpu.memory_space<vmem>>, vector<1x32x256xf32>
    %cst_2 = arith.constant dense<0.000000e+00> : vector<1x32xf32>
    %2 = vector.multi_reduction <add>, %1, %cst_2 [2] : vector<1x32x256xf32> to vector<1x32xf32>
    %3 = arith.addf %0, %2 : vector<1x32xf32>
    %cst_3 = arith.constant 3.906250e-03 : f32
    %4 = vector.broadcast %cst_3 : f32 to vector<1x32xf32>
    %5 = arith.mulf %3, %4 : vector<1x32xf32>
    %c0_4 = arith.constant 0 : index
    %c0_5 = arith.constant 0 : index
    %6 = vector.load %arg2[%c0_4, %c0_5] : memref<2x32xf32, #tpu.memory_space<vmem>>, vector<2x32xf32>
    %cst_6 = arith.constant dense<0.000000e+00> : vector<1x2xf32>
    %7 = tpu.matmul %5, %6, %cst_6 {dimension_numbers = #tpu.dot_dimension_numbers<[1], [1], [0], [0], [0, 0, 1, 0], [], []>} : vector<1x32xf32>, vector<2x32xf32>, vector<1x2xf32> -> vector<1x2xf32>
    %cst_7 = arith.constant 0.000000e+00 : f32
    %8 = vector.broadcast %cst_7 : f32 to vector<1x2xf32>
    %9 = arith.maximumf %7, %8 : vector<1x2xf32>
    %c0_8 = arith.constant 0 : index
    %c0_9 = arith.constant 0 : index
    %10 = vector.load %arg3[%c0_8, %c0_9] : memref<32x2xf32, #tpu.memory_space<vmem>>, vector<32x2xf32>
    %cst_10 = arith.constant dense<0.000000e+00> : vector<1x32xf32>
    %11 = tpu.matmul %9, %10, %cst_10 {dimension_numbers = #tpu.dot_dimension_numbers<[1], [1], [0], [0], [0, 0, 1, 0], [], []>} : vector<1x2xf32>, vector<32x2xf32>, vector<1x32xf32> -> vector<1x32xf32>
    %12 = arith.negf %11 : vector<1x32xf32>
    %13 = math.exp %12 : vector<1x32xf32>
    %cst_11 = arith.constant 1.000000e+00 : f32
    %14 = vector.broadcast %cst_11 : f32 to vector<1x32xf32>
    %15 = arith.addf %14, %13 : vector<1x32xf32>
    %16 = arith.divf %14, %15 : vector<1x32xf32>
    %c0_12 = arith.constant 0 : index
    %c0_13 = arith.constant 0 : index
    %c0_14 = arith.constant 0 : index
    %17 = vector.load %arg1[%c0_12, %c0_13, %c0_14] : memref<1x32x256xf32, #tpu.memory_space<vmem>>, vector<1x32x256xf32>
    %18 = vector.shape_cast %16 : vector<1x32xf32> to vector<1x32x1xf32>
    %19 = vector.broadcast %18 : vector<1x32x1xf32> to vector<1x32x256xf32>
    %20 = arith.mulf %17, %19 : vector<1x32x256xf32>
    %c0_15 = arith.constant 0 : index
    %c0_16 = arith.constant 0 : index
    %c0_17 = arith.constant 0 : index
    %21 = vector.load %arg4[%c0_15, %c0_16, %c0_17] : memref<1x32x256xf32, #tpu.memory_space<vmem>>, vector<1x32x256xf32>
    tpu.vector_store %arg4[%c0_15, %c0_16, %c0_17], %20 {strides = array<i32>} : memref<1x32x256xf32, #tpu.memory_space<vmem>>, vector<1x32x256xf32>,
    return
  }
  func.func @transform_0(%arg0: i32) -> (i32, i32, i32) {
    %c0_i32 = arith.constant 0 : i32
    %c0_i32_0 = arith.constant 0 : i32
    %c0_i32_1 = arith.constant 0 : i32
    return %arg0, %c0_i32, %c0_i32_0 : i32, i32, i32
  }
  func.func @transform_1(%arg0: i32) -> (i32, i32) {
    %c0_i32 = arith.constant 0 : i32
    %c0_i32_0 = arith.constant 0 : i32
    %c0_i32_1 = arith.constant 0 : i32
    return %c0_i32, %c0_i32_0 : i32, i32
  }
  func.func @transform_2(%arg0: i32) -> (i32, i32) {
    %c0_i32 = arith.constant 0 : i32
    %c0_i32_0 = arith.constant 0 : i32
    %c0_i32_1 = arith.constant 0 : i32
    return %c0_i32, %c0_i32_0 : i32, i32
  }
  func.func @transform_3(%arg0: i32) -> (i32, i32, i32) {
    %c0_i32 = arith.constant 0 : i32
    %c0_i32_0 = arith.constant 0 : i32
    %c0_i32_1 = arith.constant 0 : i32
    return %arg0, %c0_i32, %c0_i32_0 : i32, i32, i32
  }
}

module attributes {stable_mosaic.version = 11 : i64} {
  func.func @_ca_fused_kernel(%arg0: i32, %arg1: memref<1x32x256xf32, #tpu.memory_space<vmem>>, %arg2: memref<2x32xf32, #tpu.memory_space<vmem>>, %arg3: memref<32x2xf32, #tpu.memory_space<vmem>>, %arg4: memref<1x32x256xf32, #tpu.memory_space<vmem>>) attributes {dimension_semantics = [#tpu.dimension_semantics<parallel>], iteration_bounds = array<i64: 2>, scalar_prefetch = 0 : i64, scratch_operands = 0 : i64, tpu.core_type = #tpu.core_type<tc>, window_params = [{transform_indices = @transform_0, window_bounds = array<i64: 1, 32, 256>}, {pipeline_mode = #tpu.pipeline_mode<synchronous>, transform_indices = @transform_1, window_bounds = array<i64: 2, 32>}, {pipeline_mode = #tpu.pipeline_mode<synchronous>, transform_indices = @transform_2, window_bounds = array<i64: 32, 2>}, {transform_indices = @transform_3, window_bounds = array<i64: 1, 32, 256>}]} {
    %cst = arith.constant 0.000000e+00 : f32
    %0 = vector.broadcast %cst : f32 to vector<1x32xf32>
    %c0 = arith.constant 0 : index
    %c0_0 = arith.constant 0 : index
    %c0_1 = arith.constant 0 : index
    %1 = vector.load %arg1[%c0, %c0_0, %c0_1] : memref<1x32x256xf32, #tpu.memory_space<vmem>>, vector<1x32x256xf32>
    %cst_2 = arith.constant dense<0.000000e+00> : vector<1x32xf32>
    %2 = vector.multi_reduction <add>, %1, %cst_2 [2] : vector<1x32x256xf32> to vector<1x32xf32>
    %3 = arith.addf %0, %2 : vector<1x32xf32>
    %cst_3 = arith.constant 3.906250e-03 : f32
    %4 = vector.broadcast %cst_3 : f32 to vector<1x32xf32>
    %5 = arith.mulf %3, %4 : vector<1x32xf32>
    %c0_4 = arith.constant 0 : index
    %c0_5 = arith.constant 0 : index
    %6 = vector.load %arg2[%c0_4, %c0_5] : memref<2x32xf32, #tpu.memory_space<vmem>>, vector<2x32xf32>
    %cst_6 = arith.constant dense<0.000000e+00> : vector<1x2xf32>
    %7 = tpu.matmul %5, %6, %cst_6 {dimension_numbers = #tpu.dot_dimension_numbers<[1], [1], [0], [0], [0, 0, 1, 0], [], []>} : vector<1x32xf32>, vector<2x32xf32>, vector<1x2xf32> -> vector<1x2xf32>
    %cst_7 = arith.constant 0.000000e+00 : f32
    %8 = vector.broadcast %cst_7 : f32 to vector<1x2xf32>
    %9 = arith.maximumf %7, %8 : vector<1x2xf32>
    %c0_8 = arith.constant 0 : index
    %c0_9 = arith.constant 0 : index
    %10 = vector.load %arg3[%c0_8, %c0_9] : memref<32x2xf32, #tpu.memory_space<vmem>>, vector<32x2xf32>
    %cst_10 = arith.constant dense<0.000000e+00> : vector<1x32xf32>
    %11 = tpu.matmul %9, %10, %cst_10 {dimension_numbers = #tpu.dot_dimension_numbers<[1], [1], [0], [0], [0, 0, 1, 0], [], []>} : vector<1x2xf32>, vector<32x2xf32>, vector<1x32xf32> -> vector<1x32xf32>
    %12 = arith.negf %11 : vector<1x32xf32>
    %13 = math.exp %12 : vector<1x32xf32>
    %cst_11 = arith.constant 1.000000e+00 : f32
    %14 = vector.broadcast %cst_11 : f32 to vector<1x32xf32>
    %15 = arith.addf %14, %13 : vector<1x32xf32>
    %16 = arith.divf %14, %15 : vector<1x32xf32>
    %c0_12 = arith.constant 0 : index
    %c0_13 = arith.constant 0 : index
    %c0_14 = arith.constant 0 : index
    %17 = vector.load %arg1[%c0_12, %c0_13, %c0_14] : memref<1x32x256xf32, #tpu.memory_space<vmem>>, vector<1x32x256xf32>
    %18 = vector.shape_cast %16 : vector<1x32xf32> to vector<1x32x1xf32>
    %19 = vector.broadcast %18 : vector<1x32x1xf32> to vector<1x32x256xf32>
    %20 = arith.mulf %17, %19 : vector<1x32x256xf32>
    %c0_15 = arith.constant 0 : index
    %c0_16 = arith.constant 0 : index
    %c0_17 = arith.constant 0 : index
    %21 = vector.load %arg4[%c0_15, %c0_16, %c0_17] : memref<1x32x256xf32, #tpu.memory_space<vmem>>, vector<1x32x256xf32>
    tpu.vector_store %arg4[%c0_15, %c0_16, %c0_17], %20 {strides = array<i32>} : memref<1x32x256xf32, #tpu.memory_space<vmem>>, vector<1x32x256xf32>,
    return
  }
  func.func @transform_0(%arg0: i32) -> (i32, i32, i32) {
    %c0_i32 = arith.constant 0 : i32
    %c0_i32_0 = arith.constant 0 : i32
    %c0_i32_1 = arith.constant 0 : i32
    return %arg0, %c0_i32, %c0_i32_0 : i32, i32, i32
  }
  func.func @transform_1(%arg0: i32) -> (i32, i32) {
    %c0_i32 = arith.constant 0 : i32
    %c0_i32_0 = arith.constant 0 : i32
    %c0_i32_1 = arith.constant 0 : i32
    return %c0_i32, %c0_i32_0 : i32, i32
  }
  func.func @transform_2(%arg0: i32) -> (i32, i32) {
    %c0_i32 = arith.constant 0 : i32
    %c0_i32_0 = arith.constant 0 : i32
    %c0_i32_1 = arith.constant 0 : i32
    return %c0_i32, %c0_i32_0 : i32, i32
  }
  func.func @transform_3(%arg0: i32) -> (i32, i32, i32) {
    %c0_i32 = arith.constant 0 : i32
    %c0_i32_0 = arith.constant 0 : i32
    %c0_i32_1 = arith.constant 0 : i32
    return %arg0, %c0_i32, %c0_i32_0 : i32, i32, i32
  }
}

</mosaic_0001>

<bundles_post_ra>
// kernel: tpu_custom_call.1
= control target key start
LH: loop header
LB: loop body
LE: loop exit
PB: predicated region body
PF: predicated region fallthrough
CT: control target
= control target key end

     0   :  { %8 = vsyncpa [#allocation3], 0  ;;  %s792_s0 = inlined_call_operand.hbm [shape: f32[2,32,256], index: 0, kind: input, shape index: {}]   ;;  %s793_s1 = inlined_call_operand.vmem [shape: f32[2,32], index: 1, kind: input, shape index: {}]   ;;  %s794_s2 = inlined_call_operand.vmem [shape: f32[32,2], index: 2, kind: input, shape index: {}]   ;;  %s795_s3 = inlined_call_operand.hbm [shape: f32[2,32,256], index: 3, kind: output, shape index: {}]  }
   0x1   :  { %10 = vsyncpa [#allocation3 + $0x1], 0 }
   0x2   :  { %11 = vsyncpa [#allocation4], 0  ;;  %s625_s12 = smov 0   ;;  %s627_s13 = smov 0  }
   0x3   :  { %s629_s14 = smov 0   ;;  %s631_s15 = smov 0  }
   0x4 LB: > { %s644_s16 = sadd.s32 4294967295, %s598_s15   ;;  %s647_s17 = sadd.s32 1, %s598_s15   ;;  %s598_s15 = sphi %s631_s15, %s803_s15   ;;  %s594_s14 = sphi %s629_s14, %s802_s14   ;;  %s590_s13 = sphi %s627_s13, %s801_s13   ;;  %s586_s12 = sphi %s625_s12, %s800_s12  }
   0x5   : > { %s21_s18 = ssub.s32 %s598_s15, %s647_s17  ;;  %s24_s19 = sadd.s32 1, %s594_s14 }
   0x6   : > { %p22_p0 = scmp.eq.s32.totalorder %s21_s18, 0  ;;  %p31_p1 = scmp.ne.s32.totalorder %s594_s14, %s590_s13 }
   0x7   : > { %p32_p2 = scmp.eq.s32.totalorder %s598_s15, 0  ;;  %p37_p3 = scmp.ne.s32.totalorder %s590_s13, %s586_s12 }
   0x8   : > { %s657_s20 = scalar_select %p22_p0, %s594_s14, %s24_s19  }
   0x9   : > { %p659_p4 = por %p32_p2, %p31_p1  ;;  %p38_p5 = scmp.eq.s32.totalorder %s644_s16, 0 }
   0xa   : > { %p103_p6 = scmp.eq.s32.totalorder %s644_s16, 1  ;;  %p455_p8 = scmp.lt.s32.totalorder %s598_s15, 2 }
   0xb   : > { %p665_p7 = por %p38_p5, %p37_p3  ;;  %s135_s24 = sand.u32 1, %s594_s14  }
   0xc   : > { %p670_p9 = por %p103_p6, %p31_p1  ;;  %s428_s25 = sshll.u32 %s135_s24, 6 }
   0xd   : > { %s445_s26 = sshll.u32 %s598_s15, 6  ;;  %s139_s30 = scalar_lea.vmem [#allocation2], %s428_s25 }
   0xe   : > { %s144_s29 = scalar_lea.hbm %s792_s0, %s445_s26  ;;  %s147_s4 = sshll.u32 %s139_s30, 4  ;;  %s148_s4 = int_to_ptr.vmem [resolvable:$true] %s147_s4 }
   0xf   : > { %s145_s5 = sshll.u32 %s144_s29, 4  ;;  %p681_p10 = pnand %p455_p8, %p659_p4  ;;  %s146_s5 = int_to_ptr.hbm [resolvable:$true] %s145_s5 }
  0x10   : > { %p431_p11 = scmp.ge.s32.totalorder %s598_s15, 1  ;;  %s136_s7 = scalar_lea.sflag [#allocation3], %s135_s24 }
  0x11   : > { %s502_s8 = sshra.s32 %s146_s5, 4  ;;  %p506_p13 = pneg %p681_p10  ;;  %s503_s8 = int_to_ptr.hbm [resolvable:$true] %s502_s8 }
  0x12   : > { %s504_s9 = scalar_lea.hbm %s503_s8, 64  ;;  %s509_s12 = scalar_lea.hbm %s792_s0, 128 }
  0x13   : > { %p505_p12 = scmp.ne.s32.totalorder %s503_s8, %s504_s9  ;;  %p510_p2 = scmp.lt.s32.totalorder %s503_s8, %s792_s0 }
  0x14   : > { %p511_p3 = scmp.lt.s32.totalorder %s509_s12, %s504_s9 }
  0x15   : > { %p507_p0 = pnand %p506_p13, %p505_p12 }
  0x16   : > { %p512_p4 = por %p511_p3, %p510_p2 }
  0x17   : > { %p508_p1 = pneg %p507_p0 }
  0x19   : > { %p513_p5 = pnand %p512_p4, %p508_p1 }
  0x1b   : > { %516 = shalt.err (!%p513_p5)
}
  0x1c   : > { %s600_s21 = smov 256   ;;  %s601_s24 = smov 16  }
  0x1d   : > { %454 = dma.hbm_to_vmem [thread:$0]  (!%p681_p10), %s146_s5, 1024, %s148_s4, %s136_s7, %s600_s21, %s600_s21, %s601_s24  }
  0x1e   : > { %p155_p6 = scmp.lt.s32.totalorder %s598_s15, 3 }
  0x20   : > { %p156_p8 = pnand %p431_p11, %p155_p6 }
  0x21   : > { %s161_s25 = sand.u32 (!%p156_p8), 1, %s590_s13  }
  0x22   : > { %159 = sbr.rel (%p156_p8) target bundleno = 584 (0x248), region = 32  ;;  %s432_s26 = sshll.u32 (!%p156_p8), %s161_s25, 6 }
  0x23   : > { %s162_s27 = scalar_lea.sflag (!%p156_p8), [#allocation3], %s161_s25  ;;  %s165_s28 = scalar_lea.vmem (!%p156_p8), [#allocation2], %s432_s26 }
  0x27   : > { %577 = dma.done.wait (%p665_p7), %s162_s27, 1024  }
  0x28   : > { %579 = vsyncadd (%p665_p7), %s162_s27, 4294966272  ;;  %v704_v0 = vld [vmem:[%s165_s28] sm:$0xff]  ;;  %v706_v1 = vld [vmem:[%s165_s28 + $0x8] sm:$0xff]  ;;  %vm232_vm0 = vcmask 261120   ;;  %vm263_vm1 = vcmask 15360   ;;  %v217_v16 = vlaneseq  ;;  %vm222_vm2 = vcmask 130112  }
  0x29   : > { %v708_v2 = vld [vmem:[%s165_s28 + $0x20] sm:$0xff]  ;;  %v192_v3 = vadd.f32 %v706_v1, %v704_v0  ;;  %v712_v4 = vld [vmem:[%s165_s28 + $0x28] sm:$0xff]  ;;  %v716_v6 = vld [vmem:[%s165_s28 + $0x10] sm:$0xff]  ;;  %vm226_vm3 = vcmask 195712   ;;  %vm230_vm4 = vcmask 261312   ;;  %s446_s10 = sshll.u32 %s644_s16, 6 }
  0x2a   : > { %v198_v5 = vadd.f32 %v712_v4, %v708_v2  ;;  %v718_v7 = vld [vmem:[%s165_s28 + $0x18] sm:$0xff]  ;;  %v720_v8 = vld [vmem:[%s165_s28 + $0x30] sm:$0xff]  ;;  %v212_v12 = vld [vmem:[%s793_s1] sm:$0x3]  ;;  %v218_v19 = vand.u32 127, %v217_v16  ;;  %v320_v39 = vshrl.u32 %v217_v16, 7  ;;  %s366_s18 = scalar_lea.hbm %s795_s3, %s446_s10 }
  0x2b   : > { %193 = vadd.xlane.f32.xlu0 %v192_v3  ;;  %v722_v9 = vld [vmem:[%s165_s28 + $0x38] sm:$0xff]  ;;  %v195_v10 = vadd.f32 %v718_v7, %v716_v6  ;;  %433 = vmatpush.xpose.msk.msra.mxu0 %vm232_vm0, %v212_v12  ;;  %v261_v14 = vld [vmem:[%s794_s2 + $0x10] sm:$0xff]  ;;  %v260_v15 = vld [vmem:[%s794_s2 + $0x8] sm:$0xff]  ;;  %s602_s19 = smov [#allocation5]   ;;  %s369_s24 = sshll.u32 %s366_s18, 4  ;;  %s370_s24 = int_to_ptr.hbm [resolvable:$true] %s369_s24 }
  0x2c   : > { %199 = vadd.xlane.f32.xlu1 %v198_v5  ;;  %v201_v11 = vadd.f32 %v722_v9, %v720_v8  ;;  %v262_v13 = vld [vmem:[%s794_s2 + $0x18] sm:$0xff]  ;;  %v220_v21 = vadd.s32 4294967288, %v218_v19  ;;  %v224_v22 = vadd.s32 4294967280, %v218_v19  ;;  %v228_v25 = vadd.s32 4294967272, %v218_v19  ;;  %v259_v36 = vld [vmem:[%s794_s2] sm:$0xff]  ;;  %493 = vset.pattern.permute.xlu2 %v320_v39  ;;  %s758_s21 = sshll.u32 %s602_s19, 4  ;;  %s368_s21 = int_to_ptr.vmem [resolvable:$true] %s758_s21 }
  0x2d   : > { %435 = vmatpush.xpose.msk.msra.mxu1 %vm263_vm1, %v262_v13  ;;  %v339_v40 = vadd.s32 24, %v320_v39  ;;  %v333_v41 = vadd.s32 16, %v320_v39  ;;  %v327_v57 = vadd.s32 8, %v320_v39  ;;  %s546_s16 = sshra.s32 %s370_s24, 4  ;;  %s552_s28 = scalar_lea.hbm %s795_s3, 128  ;;  %s547_s16 = int_to_ptr.hbm [resolvable:$true] %s546_s16 }
  0x2e   : > { %s548_s25 = scalar_lea.hbm %s547_s16, 64  ;;  %p553_p12 = scmp.lt.s32.totalorder %s547_s16, %s795_s3 }
  0x2f   : > { %496 = vset.pattern.permute.xlu1 %v339_v40  ;;  %495 = vset.pattern.permute.xlu0 %v333_v41  ;;  %p549_p7 = scmp.ne.s32.totalorder %s547_s16, %s548_s25  ;;  %p554_p13 = scmp.lt.s32.totalorder %s552_s28, %s548_s25 }
  0x31   : > { %436 = vmatpush.xpose.msk.msra.mxu1 %vm263_vm1, %v261_v14  ;;  %p550_p10 = pnand %p549_p7, %p670_p9  ;;  %p555_p0 = por %p554_p13, %p553_p12 }
  0x33   : > { %196 = vadd.xlane.f32.xlu0 %v195_v10  ;;  %p551_p11 = pneg %p550_p10 }
  0x34   : > { %202 = vadd.xlane.f32.xlu1 %v201_v11 }
  0x35   : > { %437 = vmatpush.xpose.msk.msra.mxu1 %vm263_vm1, %v260_v15  ;;  %p556_p1 = pnand %p555_p0, %p551_p11 }
  0x39   : > { %438 = vmatpush.xpose.msk.msra.mxu1 %vm263_vm1, %v259_v36 }
  0x9e   : > { %v194_v17 = vpop.xlane.xlu0 %193 }
  0x9f   : > { %v200_v18 = vpop.xlane.xlu1 %199  ;;  %v208_v20 = vmul.f32 0.00390625, %v194_v17 }
  0xa0   : > { %v210_v23 = vmul.f32 0.00390625, %v200_v18 }
  0xa1   : > { %v219_v29 = vperm.slane %v208_v20, %v218_v19 }
  0xa2   : > { %v225_v31 = vperm.slane %v210_v23, %v224_v22 }
  0xa6   : > { %v197_v24 = vpop.xlane.xlu0 %196 }
  0xa7   : > { %v209_v26 = vmul.f32 0.00390625, %v197_v24  ;;  %v203_v27 = vpop.xlane.xlu1 %202 }
  0xa8   : > { %v211_v28 = vmul.f32 0.00390625, %v203_v27 }
  0xa9   : > { %v221_v30 = vperm.slane %v209_v26, %v220_v21 }
  0xaa   : > { %v229_v32 = vperm.slane %v211_v28, %v228_v25 }
  0xab   : > { %v223_v33 = vsel %vm222_vm2, %v221_v30, %v219_v29 }
  0xac   : > { %v227_v34 = vsel %vm226_vm3, %v225_v31, %v223_v33 }
  0xad   : > { %v231_v35 = vsel %vm230_vm4, %v229_v32, %v227_v34 }
  0xae   : > { %434 = vmatmul.msk.f32.vlgmr.msra.gmra.mxu0 %vm232_vm0, %v231_v35 }
 0x12b   : > { %v255_v37 = vpop.f32.mrf.mxu0 }
 0x12c   : > { %v258_v38 = vmax.f32 %v255_v37, 0.0 }
 0x12e   : > { %439 = vmatmul.msk.f32.vlgmr.msra.gmra.mxu1 %vm263_vm1, %v258_v38 }
 0x1ab   : > { %v296_v42 = vpop.f32.mrf.mxu1 }
 0x1ac   : > { %v440_v43 = vmul.f32 -1.442695, %v296_v42 }
 0x1ae   : > { %498 = vpow2.f32 %v440_v43 }
 0x1b4   : > { %v499_v44 = vpop.eup %498 }
 0x1b5   : > { %v302_v45 = vadd.f32 1.0, %v499_v44 }
 0x1b7   : > { %500 = vrcp.f32 %v302_v45  ;;  %v314_v49 = vand.u32 2147483648, %v302_v45  ;;  %v312_v51 = vand.u32 2147483647, %v302_v45  ;;  %vm308_vm6 = vweird.f32 %v302_v45 }
 0x1b9   : > { %v315_v53 = vor.u32 1.1754944e-38, %v314_v49  ;;  %vm313_vm8 = vcmp.eq.f32.partialorder %v312_v51, 8.507059e+37 }
 0x1bd   : > { %v501_v46 = vpop.eup %500 }
 0x1be   : > { %v304_v47 = vmul.f32 %v501_v46, %v302_v45  ;;  %vm309_vm5 = vweird.f32 %v501_v46 }
 0x1bf   : > { %vm310_vm7 = vmor %vm308_vm6, %vm309_vm5 }
 0x1c0   : > { %v305_v48 = vsub.f32 1.0, %v304_v47 }
 0x1c2   : > { %v306_v50 = vmul.f32 %v501_v46, %v305_v48 }
 0x1c4   : > { %v307_v52 = vadd.f32 %v501_v46, %v306_v50 }
 0x1c6   : > { %v311_v54 = vsel %vm310_vm7, %v501_v46, %v307_v52 }
 0x1c7   : > { %v316_v55 = vsel %vm313_vm8, %v315_v53, %v311_v54 }
 0x1c8   : > { %v318_v56 = vperm.slane %v316_v55, 0 }
 0x1ca   : > { %341 = vperm.xlu1 %496, %v318_v56   ;;  %335 = vperm.xlu0 %495, %v318_v56  }
 0x1cb   : > { %323 = vperm.xlu2 %493, %v318_v56  }
 0x1d2   : > { %497 = vset.pattern.permute.xlu0 %v339_v40 }
 0x1d3   : > { %494 = vset.pattern.permute.xlu2 %v327_v57 }
 0x1db   : > { %329 = vperm.xlu2 %494, %v318_v56  }
 0x225   : > { %v324_v58 = vpop.permute.xlu2 %323 }
 0x226   : > { %v343_v59 = vmul.f32 %v324_v58, %v704_v0  ;;  %v344_v60 = vmul.f32 %v324_v58, %v706_v1 }
 0x228   : > { %351 = vst [vmem:[#allocation5] sm:$0xff] %v343_v59 }
 0x229   : > { %352 = vst [vmem:[#allocation5 + $0x8] sm:$0xff] %v344_v60 }
 0x235   : > { %v330_v61 = vpop.permute.xlu2 %329 }
 0x236   : > { %v345_v62 = vmul.f32 %v330_v61, %v716_v6  ;;  %v346_v63 = vmul.f32 %v330_v61, %v718_v7 }
 0x238   : > { %353 = vst [vmem:[#allocation5 + $0x10] sm:$0xff] %v345_v62 }
 0x239   : > { %354 = vst [vmem:[#allocation5 + $0x18] sm:$0xff] %v346_v63 }
 0x23c   : > { %v342_v3 = vpop.permute.xlu1 %341  ;;  %v336_v5 = vpop.permute.xlu0 %335 }
 0x23d   : > { %v349_v0 = vmul.f32 %v342_v3, %v720_v8  ;;  %v350_v1 = vmul.f32 %v342_v3, %v722_v9  ;;  %v347_v6 = vmul.f32 %v336_v5, %v708_v2  ;;  %v348_v7 = vmul.f32 %v336_v5, %v712_v4 }
 0x23f   : > { %357 = vst [vmem:[#allocation5 + $0x30] sm:$0xff] %v349_v0 }
 0x240   : > { %358 = vst [vmem:[#allocation5 + $0x38] sm:$0xff] %v350_v1 }
 0x241   : > { %355 = vst [vmem:[#allocation5 + $0x20] sm:$0xff] %v347_v6 }
 0x242   : > { %356 = vst [vmem:[#allocation5 + $0x28] sm:$0xff] %v348_v7 }
 0x243   : > { %559 = shalt.err (!%p556_p1)
}
 0x244   : > { %s603_s29 = smov 256   ;;  %s604_s30 = smov 16  }
 0x245   : > { %449 = dma.vmem_to_hbm [thread:$0]  (%p670_p9), %s368_s21, 1024, %s370_s24, [#allocation4], %s603_s29, %s603_s29, %s604_s30  }
 0x246   : > { %581 = dma.done.wait (%p670_p9), [#allocation4], 1024  }
 0x247   : > { %583 = vsyncadd (%p670_p9), [#allocation4], 4294966272 }
 0x248 PF: > { %p14_p2 = scmp.ge.s32.totalorder %s647_s17, 4   ;;  %s800_s12 = smov %s590_s13 }
 0x249   : > { %s801_s13 = smov %s594_s14  ;;  %s802_s14 = smov %s657_s20 }
 0x24a   : > { %s803_s15 = smov %s647_s17  ;;  %16 = sbr.rel (!%p14_p2) target bundleno = 4 (0x4), region = 70 }
 0x24f   :  { %386 = vsyncpa [#allocation3], 1 }
 0x250   :  { %388 = vsyncpa [#allocation3 + $0x1], 1 }
 0x251   :  { %389 = vsyncpa [#allocation4], 1 }
 0x252   :  { %391 = vsyncpa [#allocation4 + $0x1], 1 }

// kernel: tpu_custom_call.1
= control target key start
LH: loop header
LB: loop body
LE: loop exit
PB: predicated region body
PF: predicated region fallthrough
CT: control target
= control target key end

     0   :  { %8 = vsyncpa [#allocation3], 0  ;;  %s845_s0 = inlined_call_operand.hbm [shape: f32[2,32,256], index: 0, kind: input, shape index: {}]   ;;  %s846_s1 = inlined_call_operand.vmem [shape: f32[2,32], index: 1, kind: input, shape index: {}]   ;;  %s847_s2 = inlined_call_operand.vmem [shape: f32[32,2], index: 2, kind: input, shape index: {}]   ;;  %s848_s3 = inlined_call_operand.hbm [shape: f32[2,32,256], index: 3, kind: output, shape index: {}]  }
   0x1   :  { %10 = vsyncpa [#allocation3 + $0x1], 0 }
   0x2   :  { %11 = vsyncpa [#allocation4], 0 }
   0x3   :  { %13 = vsyncpa [#allocation4 + $0x1], 0  ;;  %s660_s12 = smov 0   ;;  %s662_s13 = smov 0  }
   0x4   :  { %s664_s14 = smov 0   ;;  %s666_s15 = smov 0  }
   0x5 LB: > { %s681_s16 = sadd.s32 4294967295, %s634_s15   ;;  %s455_s17 = sadd.s32 4294967294, %s634_s15   ;;  %s634_s15 = sphi %s666_s15, %s858_s15   ;;  %s630_s14 = sphi %s664_s14, %s857_s14   ;;  %s626_s13 = sphi %s662_s13, %s856_s13   ;;  %s622_s12 = sphi %s660_s12, %s855_s12  }
   0x6   : > { %s685_s18 = sadd.s32 1, %s634_s15   ;;  %s26_s19 = sadd.s32 1, %s630_s14 }
   0x7   : > { %s23_s20 = ssub.s32 %s634_s15, %s685_s18  ;;  %p33_p0 = scmp.ne.s32.totalorder %s630_s14, %s626_s13 }
   0x8   : > { %p24_p1 = scmp.eq.s32.totalorder %s23_s20, 0  ;;  %p34_p2 = scmp.eq.s32.totalorder %s634_s15, 0 }
   0x9   : > { %p39_p3 = scmp.ne.s32.totalorder %s626_s13, %s622_s12  ;;  %p40_p4 = scmp.eq.s32.totalorder %s681_s16, 0 }
   0xa   : > { %s697_s21 = scalar_select %p24_p1, %s630_s14, %s26_s19  }
   0xb   : > { %p699_p5 = por %p34_p2, %p33_p0  ;;  %p703_p6 = por %p40_p4, %p39_p3 }
   0xc   : > { %p105_p7 = scmp.eq.s32.totalorder %s681_s16, 1  ;;  %p111_p8 = scmp.eq.s32.totalorder %s455_s17, 1 }
   0xd   : > { %p491_p10 = scmp.lt.s32.totalorder %s634_s15, 2  ;;  %s137_s26 = sand.u32 1, %s630_s14  }
   0xe   : > { %p710_p11 = por %p105_p7, %p33_p0  ;;  %p714_p12 = por %p111_p8, %p39_p3 }
   0xf   : > { %s477_s27 = sshll.u32 %s634_s15, 6  ;;  %s458_s28 = sshll.u32 %s137_s26, 6 }
  0x10   : > { %s146_s4 = scalar_lea.hbm %s845_s0, %s477_s27  ;;  %s141_s6 = scalar_lea.vmem [#allocation2], %s458_s28 }
  0x11   : > { %s147_s5 = sshll.u32 %s146_s4, 4  ;;  %s149_s7 = sshll.u32 %s141_s6, 4  ;;  %s148_s5 = int_to_ptr.hbm [resolvable:$true] %s147_s5  ;;  %s150_s7 = int_to_ptr.vmem [resolvable:$true] %s149_s7 }
  0x12   : > { %p725_p13 = pnand %p491_p10, %p699_p5  ;;  %p461_p0 = scmp.ge.s32.totalorder %s634_s15, 1 }
  0x13   : > { %p157_p1 = scmp.lt.s32.totalorder %s634_s15, 3  ;;  %s138_s9 = scalar_lea.sflag [#allocation3], %s137_s26 }
  0x14   : > { %s538_s10 = sshra.s32 %s148_s5, 4  ;;  %p542_p3 = pneg %p725_p13  ;;  %s539_s10 = int_to_ptr.hbm [resolvable:$true] %s538_s10 }
  0x15   : > { %s540_s11 = scalar_lea.hbm %s539_s10, 64  ;;  %s545_s20 = scalar_lea.hbm %s845_s0, 128 }
  0x16   : > { %p541_p2 = scmp.ne.s32.totalorder %s539_s10, %s540_s11  ;;  %p546_p5 = scmp.lt.s32.totalorder %s539_s10, %s845_s0 }
  0x17   : > { %p547_p8 = scmp.lt.s32.totalorder %s545_s20, %s540_s11 }
  0x18   : > { %p543_p4 = pnand %p542_p3, %p541_p2 }
  0x19   : > { %p548_p10 = por %p547_p8, %p546_p5 }
  0x1a   : > { %p544_p7 = pneg %p543_p4 }
  0x1c   : > { %p549_p9 = pnand %p548_p10, %p544_p7 }
  0x1e   : > { %552 = shalt.err (!%p549_p9)
}
  0x1f   : > { %s636_s26 = smov 256   ;;  %s637_s28 = smov 16  }
  0x20   : > { %486 = dma.hbm_to_vmem [thread:$0]  (!%p725_p13), %s148_s5, 1024, %s150_s7, %s138_s9, %s636_s26, %s636_s26, %s637_s28  }
  0x21   : > { %p158_p2 = pnand %p461_p0, %p157_p1 }
  0x22   : > { %s746_s29 = sand.u32 (!%p158_p2), 1, %s626_s13  }
  0x23   : > { %161 = sbr.rel (%p158_p2) target bundleno = 583 (0x247), region = 32  ;;  %s462_s30 = sshll.u32 (!%p158_p2), %s746_s29, 6 }
  0x24   : > { %s164_s4 = scalar_lea.sflag (!%p158_p2), [#allocation3], %s746_s29  ;;  %s167_s6 = scalar_lea.vmem (!%p158_p2), [#allocation2], %s462_s30 }
  0x28   : > { %613 = dma.done.wait (%p703_p6), %s164_s4, 1024  }
  0x29   : > { %615 = vsyncadd (%p703_p6), %s164_s4, 4294966272  ;;  %v756_v0 = vld [vmem:[%s167_s6] sm:$0xff]  ;;  %v758_v1 = vld [vmem:[%s167_s6 + $0x8] sm:$0xff]  ;;  %vm239_vm0 = vcmask 261120   ;;  %vm270_vm1 = vcmask 15360   ;;  %v224_v16 = vlaneseq  ;;  %vm229_vm2 = vcmask 130112  }
  0x2a   : > { %v760_v2 = vld [vmem:[%s167_s6 + $0x20] sm:$0xff]  ;;  %v199_v3 = vadd.f32 %v758_v1, %v756_v0  ;;  %v764_v4 = vld [vmem:[%s167_s6 + $0x28] sm:$0xff]  ;;  %v768_v6 = vld [vmem:[%s167_s6 + $0x10] sm:$0xff]  ;;  %vm233_vm3 = vcmask 195712   ;;  %vm237_vm4 = vcmask 261312   ;;  %s190_s22 = scalar_lea.vmem [#allocation5], %s462_s30 }
  0x2b   : > { %v205_v5 = vadd.f32 %v764_v4, %v760_v2  ;;  %v770_v7 = vld [vmem:[%s167_s6 + $0x18] sm:$0xff]  ;;  %v772_v8 = vld [vmem:[%s167_s6 + $0x30] sm:$0xff]  ;;  %v219_v12 = vld [vmem:[%s846_s1] sm:$0x3]  ;;  %v225_v19 = vand.u32 127, %v224_v16  ;;  %v327_v39 = vshrl.u32 %v224_v16, 7 }
  0x2c   : > { %200 = vadd.xlane.f32.xlu0 %v199_v3  ;;  %v774_v9 = vld [vmem:[%s167_s6 + $0x38] sm:$0xff]  ;;  %v202_v10 = vadd.f32 %v770_v7, %v768_v6  ;;  %464 = vmatpush.xpose.msk.msra.mxu0 %vm239_vm0, %v219_v12  ;;  %v268_v14 = vld [vmem:[%s847_s2 + $0x10] sm:$0xff]  ;;  %v267_v15 = vld [vmem:[%s847_s2 + $0x8] sm:$0xff]  ;;  %s478_s27 = sshll.u32 %s681_s16, 6  ;;  %s379_s6 = sshll.u32 %s190_s22, 4  ;;  %s380_s6 = int_to_ptr.vmem [resolvable:$true] %s379_s6 }
  0x2d   : > { %206 = vadd.xlane.f32.xlu1 %v205_v5  ;;  %v208_v11 = vadd.f32 %v774_v9, %v772_v8  ;;  %v269_v13 = vld [vmem:[%s847_s2 + $0x18] sm:$0xff]  ;;  %v227_v21 = vadd.s32 4294967288, %v225_v19  ;;  %v231_v22 = vadd.s32 4294967280, %v225_v19  ;;  %v235_v25 = vadd.s32 4294967272, %v225_v19  ;;  %v266_v36 = vld [vmem:[%s847_s2] sm:$0xff]  ;;  %529 = vset.pattern.permute.xlu2 %v327_v39  ;;  %s378_s4 = scalar_lea.hbm %s848_s3, %s478_s27  ;;  %s367_s16 = scalar_lea.sflag [#allocation4], %s746_s29 }
  0x2e   : > { %466 = vmatpush.xpose.msk.msra.mxu1 %vm270_vm1, %v269_v13  ;;  %v346_v40 = vadd.s32 24, %v327_v39  ;;  %v340_v41 = vadd.s32 16, %v327_v39  ;;  %v334_v57 = vadd.s32 8, %v327_v39  ;;  %s381_s23 = sshll.u32 %s378_s4, 4  ;;  %s588_s9 = scalar_lea.hbm %s848_s3, 128  ;;  %s382_s23 = int_to_ptr.hbm [resolvable:$true] %s381_s23 }
  0x2f   : > { %s582_s30 = sshra.s32 %s382_s23, 4  ;;  %s583_s30 = int_to_ptr.hbm [resolvable:$true] %s582_s30 }
  0x30   : > { %532 = vset.pattern.permute.xlu1 %v346_v40  ;;  %531 = vset.pattern.permute.xlu0 %v340_v41  ;;  %s584_s5 = scalar_lea.hbm %s583_s30, 64  ;;  %p589_p0 = scmp.lt.s32.totalorder %s583_s30, %s848_s3 }
  0x31   : > { %p585_p6 = scmp.ne.s32.totalorder %s583_s30, %s584_s5  ;;  %p590_p1 = scmp.lt.s32.totalorder %s588_s9, %s584_s5 }
  0x32   : > { %467 = vmatpush.xpose.msk.msra.mxu1 %vm270_vm1, %v268_v14 }
  0x33   : > { %p586_p9 = pnand %p585_p6, %p710_p11  ;;  %p591_p3 = por %p590_p1, %p589_p0 }
  0x34   : > { %203 = vadd.xlane.f32.xlu0 %v202_v10 }
  0x35   : > { %209 = vadd.xlane.f32.xlu1 %v208_v11  ;;  %p587_p13 = pneg %p586_p9 }
  0x36   : > { %468 = vmatpush.xpose.msk.msra.mxu1 %vm270_vm1, %v267_v15 }
  0x37   : > { %p592_p4 = pnand %p591_p3, %p587_p13 }
  0x3a   : > { %469 = vmatpush.xpose.msk.msra.mxu1 %vm270_vm1, %v266_v36 }
  0x9f   : > { %v201_v17 = vpop.xlane.xlu0 %200 }
  0xa0   : > { %v207_v18 = vpop.xlane.xlu1 %206  ;;  %v215_v20 = vmul.f32 0.00390625, %v201_v17 }
  0xa1   : > { %v217_v23 = vmul.f32 0.00390625, %v207_v18 }
  0xa2   : > { %v226_v29 = vperm.slane %v215_v20, %v225_v19 }
  0xa3   : > { %v232_v31 = vperm.slane %v217_v23, %v231_v22 }
  0xa7   : > { %v204_v24 = vpop.xlane.xlu0 %203 }
  0xa8   : > { %v216_v26 = vmul.f32 0.00390625, %v204_v24  ;;  %v210_v27 = vpop.xlane.xlu1 %209 }
  0xa9   : > { %v218_v28 = vmul.f32 0.00390625, %v210_v27 }
  0xaa   : > { %v228_v30 = vperm.slane %v216_v26, %v227_v21 }
  0xab   : > { %v236_v32 = vperm.slane %v218_v28, %v235_v25 }
  0xac   : > { %v230_v33 = vsel %vm229_vm2, %v228_v30, %v226_v29 }
  0xad   : > { %v234_v34 = vsel %vm233_vm3, %v232_v31, %v230_v33 }
  0xae   : > { %v238_v35 = vsel %vm237_vm4, %v236_v32, %v234_v34 }
  0xaf   : > { %465 = vmatmul.msk.f32.vlgmr.msra.gmra.mxu0 %vm239_vm0, %v238_v35 }
 0x12c   : > { %v262_v37 = vpop.f32.mrf.mxu0 }
 0x12d   : > { %v265_v38 = vmax.f32 %v262_v37, 0.0 }
 0x12f   : > { %470 = vmatmul.msk.f32.vlgmr.msra.gmra.mxu1 %vm270_vm1, %v265_v38 }
 0x1ac   : > { %v303_v42 = vpop.f32.mrf.mxu1 }
 0x1ad   : > { %v471_v43 = vmul.f32 -1.442695, %v303_v42 }
 0x1af   : > { %534 = vpow2.f32 %v471_v43 }
 0x1b5   : > { %v535_v44 = vpop.eup %534 }
 0x1b6   : > { %v309_v45 = vadd.f32 1.0, %v535_v44 }
 0x1b8   : > { %536 = vrcp.f32 %v309_v45  ;;  %v321_v49 = vand.u32 2147483648, %v309_v45  ;;  %v319_v51 = vand.u32 2147483647, %v309_v45  ;;  %vm315_vm6 = vweird.f32 %v309_v45 }
 0x1ba   : > { %v322_v53 = vor.u32 1.1754944e-38, %v321_v49  ;;  %vm320_vm8 = vcmp.eq.f32.partialorder %v319_v51, 8.507059e+37 }
 0x1be   : > { %v537_v46 = vpop.eup %536 }
 0x1bf   : > { %v311_v47 = vmul.f32 %v537_v46, %v309_v45  ;;  %vm316_vm5 = vweird.f32 %v537_v46 }
 0x1c0   : > { %vm317_vm7 = vmor %vm315_vm6, %vm316_vm5 }
 0x1c1   : > { %v312_v48 = vsub.f32 1.0, %v311_v47 }
 0x1c3   : > { %v313_v50 = vmul.f32 %v537_v46, %v312_v48 }
 0x1c5   : > { %v314_v52 = vadd.f32 %v537_v46, %v313_v50 }
 0x1c7   : > { %v318_v54 = vsel %vm317_vm7, %v537_v46, %v314_v52 }
 0x1c8   : > { %v323_v55 = vsel %vm320_vm8, %v322_v53, %v318_v54 }
 0x1c9   : > { %v325_v56 = vperm.slane %v323_v55, 0 }
 0x1cb   : > { %348 = vperm.xlu1 %532, %v325_v56   ;;  %342 = vperm.xlu0 %531, %v325_v56  }
 0x1cc   : > { %330 = vperm.xlu2 %529, %v325_v56  }
 0x1d3   : > { %533 = vset.pattern.permute.xlu0 %v346_v40 }
 0x1d4   : > { %530 = vset.pattern.permute.xlu2 %v334_v57 }
 0x1dc   : > { %336 = vperm.xlu2 %530, %v325_v56  }
 0x226   : > { %v331_v58 = vpop.permute.xlu2 %330 }
 0x227   : > { %v350_v59 = vmul.f32 %v331_v58, %v756_v0  ;;  %v351_v60 = vmul.f32 %v331_v58, %v758_v1 }
 0x229   : > { %358 = vst [vmem:[%s190_s22] sm:$0xff] %v350_v59 }
 0x22a   : > { %359 = vst [vmem:[%s190_s22 + $0x8] sm:$0xff] %v351_v60 }
 0x236   : > { %v337_v61 = vpop.permute.xlu2 %336 }
 0x237   : > { %v352_v62 = vmul.f32 %v337_v61, %v768_v6  ;;  %v353_v63 = vmul.f32 %v337_v61, %v770_v7 }
 0x239   : > { %360 = vst [vmem:[%s190_s22 + $0x10] sm:$0xff] %v352_v62 }
 0x23a   : > { %361 = vst [vmem:[%s190_s22 + $0x18] sm:$0xff] %v353_v63 }
 0x23d   : > { %v349_v0 = vpop.permute.xlu1 %348  ;;  %v343_v1 = vpop.permute.xlu0 %342 }
 0x23e   : > { %v356_v3 = vmul.f32 %v349_v0, %v772_v8  ;;  %v357_v5 = vmul.f32 %v349_v0, %v774_v9  ;;  %v354_v6 = vmul.f32 %v343_v1, %v760_v2  ;;  %v355_v7 = vmul.f32 %v343_v1, %v764_v4 }
 0x240   : > { %364 = vst [vmem:[%s190_s22 + $0x30] sm:$0xff] %v356_v3 }
 0x241   : > { %365 = vst [vmem:[%s190_s22 + $0x38] sm:$0xff] %v357_v5 }
 0x242   : > { %362 = vst [vmem:[%s190_s22 + $0x20] sm:$0xff] %v354_v6 }
 0x243   : > { %363 = vst [vmem:[%s190_s22 + $0x28] sm:$0xff] %v355_v7 }
 0x244   : > { %595 = shalt.err (!%p592_p4)
}
 0x245   : > { %s638_s29 = smov 256   ;;  %s639_s17 = smov 16  }
 0x246   : > { %481 = dma.vmem_to_hbm [thread:$0]  (%p710_p11), %s380_s6, 1024, %s382_s23, %s367_s16, %s638_s29, %s638_s29, %s639_s17  }
 0x247 PF: > { %s396_s19 = sand.u32 1, %s622_s12   ;;  %p854_p7 = scmp.ge.s32.totalorder %s634_s15, 2 }
 0x248   : > { %s397_s20 = scalar_lea.sflag [#allocation4], %s396_s19 }
 0x249   : > { %p488_p5 = pnand %p854_p7, %p714_p12 }
 0x24b   : > { %p489_p8 = pneg %p488_p5 }
 0x24d   : > { %617 = dma.done.wait (%p489_p8), %s397_s20, 1024  }
 0x24e   : > { %619 = vsyncadd (%p489_p8), %s397_s20, 4294966272  ;;  %p16_p10 = scmp.ge.s32.totalorder %s685_s18, 4   ;;  %s855_s12 = smov %s626_s13 }
 0x24f   : > { %s856_s13 = smov %s630_s14  ;;  %s857_s14 = smov %s697_s21 }
 0x250   : > { %s858_s15 = smov %s685_s18  ;;  %18 = sbr.rel (!%p16_p10) target bundleno = 5 (0x5), region = 77 }
 0x255   :  { %403 = vsyncpa [#allocation3], 1 }
 0x256   :  { %405 = vsyncpa [#allocation3 + $0x1], 1 }
 0x257   :  { %406 = vsyncpa [#allocation4], 1 }
 0x258   :  { %408 = vsyncpa [#allocation4 + $0x1], 1 }

</bundles_post_ra>
